<compile_context>
chip_gen: v7x
topology: tpu7x:2x2x1
jax: 0.10.0
libtpu: 0.0.40
codegen_flags: <defaults>
</compile_context>

<pallas_src>
import functools

import jax
import jax.numpy as jnp
from jax.experimental import pallas as pl
from jax.experimental.pallas import tpu as pltpu


def _complex_score_kernel(s_ref, r_ref, d_ref, o_ref):
    """One batch tile of ComplEx scores.

    s_ref / r_ref / d_ref : (2, TB, H) plane-major gathered embeddings
                            ([0] = real plane, [1] = imag plane).
    o_ref                 : (1, 1, TB) lane-dense scores for this tile.
    """
    sr = s_ref[0].astype(jnp.float32)
    si = s_ref[1].astype(jnp.float32)
    rr = r_ref[0].astype(jnp.float32)
    ri = r_ref[1].astype(jnp.float32)
    dr = d_ref[0].astype(jnp.float32)
    di = d_ref[1].astype(jnp.float32)

    # sr*rr*dr + sr*ri*di + si*rr*di - si*ri*dr, refactored to 6 muls + 3 adds.
    term = sr * (rr * dr + ri * di) + si * (rr * di - ri * dr)
    o_ref[0, 0, :] = jnp.sum(term, axis=-1)


def _vmem_limit_bytes():
    """Generation-aware scoped-VMEM limit (<= 64 MiB, leaves DMA headroom)."""
    cap = 64 * 1024 * 1024  # v7x per-TC physical VMEM; safe lower bound
    try:
        info = pltpu.get_tpu_info()
        cap = int(getattr(info, "vmem_capacity_bytes", cap))
    except Exception:  # query unavailable -> keep conservative default
        pass
    return min(cap - 16 * 1024 * 1024, 64 * 1024 * 1024)


def _choose_batch_tile(batch, hidden, itemsize, vmem_limit_bytes, max_tile=2048):
    """Largest batch tile whose 3 double-buffered (2,TB,H) inputs fit budget."""
    sublane = {4: 8, 2: 16, 1: 32}.get(itemsize, 8)
    lane_w = ((hidden + 127) // 128) * 128          # VMEM lane padding / plane
    # 3 input streams x 2 planes x 2 pipeline buffers.
    bytes_per_row = 3 * 2 * 2 * lane_w * itemsize
    input_budget = vmem_limit_bytes // 2            # rest: temps + output bufs
    tb = min(int(input_budget // bytes_per_row), int(max_tile))

    # Keep >= 2 grid tiles when the batch allows it: v7x megacore sharding of
    # the "parallel" batch axis and live input double-buffering everywhere.
    if batch >= 2 * 128:
        tb = min(tb, max(128, (batch // 2 // 128) * 128))

    if tb >= batch:
        return batch                                # single exact-fit tile
    if tb >= 128:
        tb = (tb // 128) * 128                      # lane-dense output stores
    else:
        tb = max(sublane, (tb // sublane) * sublane)
    return tb


def complex_score_pallas(src_emb, rel_emb, dst_emb, *, batch_tile=None):
    """Plane-major (2, B, H) gathered embeddings -> (B,) ComplEx scores."""
    two, B, H = src_emb.shape
    assert two == 2 and rel_emb.shape == (2, B, H) and dst_emb.shape == (2, B, H)

    vmem_limit = _vmem_limit_bytes()
    if batch_tile is None:
        tb = _choose_batch_tile(B, H, src_emb.dtype.itemsize, vmem_limit)
    else:
        tb = min(int(batch_tile), B)
    tb = max(1, tb)
    num_tiles = pl.cdiv(B, tb)

    in_spec = pl.BlockSpec((2, tb, H), lambda i: (0, i, 0))
    out_spec = pl.BlockSpec((1, 1, tb), lambda i: (i, 0, 0))

    out = pl.pallas_call(
        _complex_score_kernel,
        out_shape=jax.ShapeDtypeStruct((num_tiles, 1, tb), jnp.float32),
        grid_spec=pltpu.PrefetchScalarGridSpec(
            num_scalar_prefetch=0,
            grid=(num_tiles,),
            in_specs=[in_spec, in_spec, in_spec],
            out_specs=out_spec,
        ),
        compiler_params=pltpu.CompilerParams(
            dimension_semantics=("parallel",),
            vmem_limit_bytes=vmem_limit,
        ),
    )(src_emb, rel_emb, dst_emb)
    # Tail rows of a partial last block hold unspecified values; slice them off.
    return out.reshape(num_tiles * tb)[:B]


class ComplExJax:
    """JAX/Pallas port of the PyTorch ComplEx module (forward only).

    Real and imaginary planes of each embedding table are stored plane-major
    as (2, N, H): [0] = real, [1] = imag.  The kernel splits planes on the
    leading (untiled) axis, so no lane-boundary slicing or H padding is
    needed, and only the actual H*4 bytes per row cross HBM.
    """

    def __init__(self, num_nodes, num_relations, hidden_channels, key,
                 dtype=jnp.float32, init_ent_embs=None):
        self.hidden_channels = hidden_channels
        k1, k2, k3, k4 = jax.random.split(key, 4)
        if init_ent_embs is not None:
            # Matches the PyTorch module: both planes start from the same
            # pretrained matrix.
            ent_real = jnp.asarray(init_ent_embs, dtype)
            ent_imag = jnp.asarray(init_ent_embs, dtype)
        else:
            # nn.Embedding default init: N(0, 1)
            ent_real = jax.random.normal(k1, (num_nodes, hidden_channels), dtype)
            ent_imag = jax.random.normal(k2, (num_nodes, hidden_channels), dtype)
        rel_real = jax.random.normal(k3, (num_relations, hidden_channels), dtype)
        rel_imag = jax.random.normal(k4, (num_relations, hidden_channels), dtype)

        self.entity_emb = jnp.stack([ent_real, ent_imag], axis=0)      # (2,N,H)
        self.relation_emb = jnp.stack([rel_real, rel_imag], axis=0)    # (2,R,H)
        # entity_embedding = real + imag (unused in forward; kept for parity)
        self.entity_embedding = ent_real + ent_imag

    def __call__(self, src, rel, dst, *, batch_tile=None):
        # Row gathers stay in XLA (see TODO at top of file); Pallas runs the
        # streaming elementwise products + hidden-dim reduction.
        s = jnp.take(self.entity_emb, src, axis=1)     # (2, B, H)
        d = jnp.take(self.entity_emb, dst, axis=1)     # (2, B, H)
        r = jnp.take(self.relation_emb, rel, axis=1)   # (2, B, H)
        return complex_score_pallas(s, r, d, batch_tile=batch_tile)


def _reference_score(model, src, rel, dst):
    s = model.entity_emb[:, src].astype(jnp.float32)
    r = model.relation_emb[:, rel].astype(jnp.float32)
    d = model.entity_emb[:, dst].astype(jnp.float32)
    sr, si = s[0], s[1]
    rr, ri = r[0], r[1]
    dr, di = d[0], d[1]
    # Original (un-refactored) ComplEx formula as the reference.
    return jnp.sum(sr * rr * dr + sr * ri * di + si * rr * di - si * ri * dr,
                   axis=-1)


if __name__ == "__main__":
    num_nodes = 32
    num_relations = 8
    hidden_channels = 32

    key = jax.random.PRNGKey(0)
    kmodel, kidx = jax.random.split(key)
    model = ComplExJax(num_nodes, num_relations, hidden_channels, kmodel)

    def make_triples(k, batch):
        ks, kr, kd = jax.random.split(k, 3)
        src = jax.random.randint(ks, (batch,), 0, num_nodes, dtype=jnp.int32)
        rel = jax.random.randint(kr, (batch,), 0, num_relations, dtype=jnp.int32)
        dst = jax.random.randint(kd, (batch,), 0, num_nodes, dtype=jnp.int32)
        return src, rel, dst

    # 1) small batch, single exact-fit tile.
    src, rel, dst = make_triples(jax.random.fold_in(kidx, 0), 8)
    score = jax.block_until_ready(model(src, rel, dst))
    ref = _reference_score(model, src, rel, dst)
    assert score.shape == (8,)
    assert jnp.allclose(score, ref, atol=1e-5, rtol=1e-5), (score, ref)

    # 2) odd batch, still a single exact-fit tile (tb == B, no padding).
    src2, rel2, dst2 = make_triples(jax.random.fold_in(kidx, 1), 37)
    score2 = jax.block_until_ready(model(src2, rel2, dst2))
    ref2 = _reference_score(model, src2, rel2, dst2)
    assert score2.shape == (37,)
    assert jnp.allclose(score2, ref2, atol=1e-5, rtol=1e-5), (score2, ref2)

    # 3) multi-tile grid with a partial final block (300 = 2*128 + 44):
    #    exercises the pad-free boundary path and the "parallel" batch grid.
    src3, rel3, dst3 = make_triples(jax.random.fold_in(kidx, 2), 300)
    score3 = jax.block_until_ready(model(src3, rel3, dst3, batch_tile=128))
    ref3 = _reference_score(model, src3, rel3, dst3)
    assert score3.shape == (300,)
    assert jnp.allclose(score3, ref3, atol=1e-5, rtol=1e-5), (score3, ref3)

    print("KERNEL_OK")
</pallas_src>

<mosaic_0001>
module attributes {stable_mosaic.version = 11 : i64} {
  func.func @_complex_score_kernel(%arg0: i32, %arg1: memref<2x8x32xf32, #tpu.memory_space<vmem>>, %arg2: memref<2x8x32xf32, #tpu.memory_space<vmem>>, %arg3: memref<2x8x32xf32, #tpu.memory_space<vmem>>, %arg4: memref<1x1x8xf32, #tpu.memory_space<vmem>>) attributes {dimension_semantics = [#tpu.dimension_semantics<parallel>], iteration_bounds = array<i64: 1>, scalar_prefetch = 0 : i64, scratch_operands = 0 : i64, tpu.core_type = #tpu.core_type<tc>, window_params = [{transform_indices = @transform_0, window_bounds = array<i64: 2, 8, 32>}, {transform_indices = @transform_1, window_bounds = array<i64: 2, 8, 32>}, {transform_indices = @transform_2, window_bounds = array<i64: 2, 8, 32>}, {transform_indices = @transform_3, window_bounds = array<i64: 1, 1, 8>}]} {
    %c0 = arith.constant 0 : index
    %c0_0 = arith.constant 0 : index
    %c0_1 = arith.constant 0 : index
    %0 = vector.load %arg1[%c0, %c0_0, %c0_1] : memref<2x8x32xf32, #tpu.memory_space<vmem>>, vector<1x8x32xf32>
    %1 = vector.shape_cast %0 : vector<1x8x32xf32> to vector<8x32xf32>
    %c1 = arith.constant 1 : index
    %c0_2 = arith.constant 0 : index
    %c0_3 = arith.constant 0 : index
    %2 = vector.load %arg1[%c1, %c0_2, %c0_3] : memref<2x8x32xf32, #tpu.memory_space<vmem>>, vector<1x8x32xf32>
    %3 = vector.shape_cast %2 : vector<1x8x32xf32> to vector<8x32xf32>
    %c0_4 = arith.constant 0 : index
    %c0_5 = arith.constant 0 : index
    %c0_6 = arith.constant 0 : index
    %4 = vector.load %arg2[%c0_4, %c0_5, %c0_6] : memref<2x8x32xf32, #tpu.memory_space<vmem>>, vector<1x8x32xf32>
    %5 = vector.shape_cast %4 : vector<1x8x32xf32> to vector<8x32xf32>
    %c1_7 = arith.constant 1 : index
    %c0_8 = arith.constant 0 : index
    %c0_9 = arith.constant 0 : index
    %6 = vector.load %arg2[%c1_7, %c0_8, %c0_9] : memref<2x8x32xf32, #tpu.memory_space<vmem>>, vector<1x8x32xf32>
    %7 = vector.shape_cast %6 : vector<1x8x32xf32> to vector<8x32xf32>
    %c0_10 = arith.constant 0 : index
    %c0_11 = arith.constant 0 : index
    %c0_12 = arith.constant 0 : index
    %8 = vector.load %arg3[%c0_10, %c0_11, %c0_12] : memref<2x8x32xf32, #tpu.memory_space<vmem>>, vector<1x8x32xf32>
    %9 = vector.shape_cast %8 : vector<1x8x32xf32> to vector<8x32xf32>
    %c1_13 = arith.constant 1 : index
    %c0_14 = arith.constant 0 : index
    %c0_15 = arith.constant 0 : index
    %10 = vector.load %arg3[%c1_13, %c0_14, %c0_15] : memref<2x8x32xf32, #tpu.memory_space<vmem>>, vector<1x8x32xf32>
    %11 = vector.shape_cast %10 : vector<1x8x32xf32> to vector<8x32xf32>
    %12 = arith.mulf %5, %9 : vector<8x32xf32>
    %13 = arith.mulf %7, %11 : vector<8x32xf32>
    %14 = arith.addf %12, %13 : vector<8x32xf32>
    %15 = arith.mulf %1, %14 : vector<8x32xf32>
    %16 = arith.mulf %5, %11 : vector<8x32xf32>
    %17 = arith.mulf %7, %9 : vector<8x32xf32>
    %18 = arith.subf %16, %17 : vector<8x32xf32>
    %19 = arith.mulf %3, %18 : vector<8x32xf32>
    %20 = arith.addf %15, %19 : vector<8x32xf32>
    %cst = arith.constant dense<0.000000e+00> : vector<8xf32>
    %21 = vector.multi_reduction <add>, %20, %cst [1] : vector<8x32xf32> to vector<8xf32>
    %c0_16 = arith.constant 0 : index
    %c0_17 = arith.constant 0 : index
    %c0_18 = arith.constant 0 : index
    %22 = vector.load %arg4[%c0_16, %c0_17, %c0_18] : memref<1x1x8xf32, #tpu.memory_space<vmem>>, vector<1x1x8xf32>
    %23 = vector.shape_cast %22 : vector<1x1x8xf32> to vector<8xf32>
    %24 = vector.shape_cast %21 : vector<8xf32> to vector<1x1x8xf32>
    tpu.vector_store %arg4[%c0_16, %c0_17, %c0_18], %24 {strides = array<i32>} : memref<1x1x8xf32, #tpu.memory_space<vmem>>, vector<1x1x8xf32>,
    return
  }
  func.func @transform_0(%arg0: i32) -> (i32, i32, i32) {
    %c0_i32 = arith.constant 0 : i32
    %c0_i32_0 = arith.constant 0 : i32
    %c0_i32_1 = arith.constant 0 : i32
    return %c0_i32, %arg0, %c0_i32_0 : i32, i32, i32
  }
  func.func @transform_1(%arg0: i32) -> (i32, i32, i32) {
    %c0_i32 = arith.constant 0 : i32
    %c0_i32_0 = arith.constant 0 : i32
    %c0_i32_1 = arith.constant 0 : i32
    return %c0_i32, %arg0, %c0_i32_0 : i32, i32, i32
  }
  func.func @transform_2(%arg0: i32) -> (i32, i32, i32) {
    %c0_i32 = arith.constant 0 : i32
    %c0_i32_0 = arith.constant 0 : i32
    %c0_i32_1 = arith.constant 0 : i32
    return %c0_i32, %arg0, %c0_i32_0 : i32, i32, i32
  }
  func.func @transform_3(%arg0: i32) -> (i32, i32, i32) {
    %c0_i32 = arith.constant 0 : i32
    %c0_i32_0 = arith.constant 0 : i32
    %c0_i32_1 = arith.constant 0 : i32
    return %arg0, %c0_i32, %c0_i32_0 : i32, i32, i32
  }
}

</mosaic_0001>

<bundles_post_ra>
// kernel: tpu_custom_call.1
= control target key start
LH: loop header
LB: loop body
LE: loop exit
PB: predicated region body
PF: predicated region fallthrough
CT: control target
= control target key end

     0   :  { %8 = vsyncpa [#allocation3], 0  ;;  %s294_s0 = inlined_call_operand.hbm [shape: f32[2,8,32], index: 0, kind: input, shape index: {}]   ;;  %s295_s1 = inlined_call_operand.hbm [shape: f32[2,8,32], index: 1, kind: input, shape index: {}]   ;;  %s296_s2 = inlined_call_operand.hbm [shape: f32[2,8,32], index: 2, kind: input, shape index: {}]   ;;  %s297_s3 = inlined_call_operand.hbm [shape: f32[1,1,8], index: 3, kind: output, shape index: {}]  }
   0x1   :  { %9 = vsyncpa [#allocation6], 0 }
   0x2   :  { %10 = vsyncpa [#allocation4], 0  ;;  %s204_s12 = smov [#allocation5]   ;;  %s205_s14 = smov [#allocation2]  }
   0x3   :  { %s28_s13 = sshll.u32 %s204_s12, 4  ;;  %s16_s15 = sshll.u32 %s205_s14, 4  ;;  %s29_s13 = int_to_ptr.vmem [resolvable:$true] %s28_s13  ;;  %s230_s15 = int_to_ptr.vmem [resolvable:$true] %s16_s15 }
   0x4   :  { %s110_s18 = scalar_lea.hbm %s295_s1, 256 }
   0x5   :  { %p111_p0 = scmp.ne.s32.totalorder %s295_s1, %s110_s18  ;;  %p114_p1 = scmp.lt.u32.totalorder %s110_s18, %s295_s1 }
   0x7   :  { %p116_p2 = pnand %p114_p1, %p111_p0 }
   0x9   :  { %119 = shalt.err (!%p116_p2)
}
   0xa   :  { %s120_s23 = scalar_lea.vmem %s29_s13, 256  ;;  %p125_p4 = scmp.lt.s32.totalorder %s29_s13, %s29_s13 }
   0xb   :  { %p121_p3 = scmp.ne.s32.totalorder %s29_s13, %s120_s23  ;;  %p126_p5 = scmp.lt.s32.totalorder %s120_s23, %s120_s23 }
   0xd   :  { %p127_p6 = por %p126_p5, %p125_p4 }
   0xf   :  { %p128_p7 = pnand %p127_p6, %p121_p3 }
  0x11   :  { %131 = shalt.err (!%p128_p7)
}
  0x12   :  { %s206_s24 = smov 128   ;;  %s207_s25 = smov 8  }
  0x13   :  { %34 = dma.hbm_to_vmem [thread:$0]  %s295_s1, 256, %s29_s13, [#allocation6], %s206_s24, %s206_s24, %s207_s25  }
  0x14   :  { %s132_s30 = scalar_lea.hbm %s294_s0, 256 }
  0x15   :  { %p133_p8 = scmp.ne.s32.totalorder %s294_s0, %s132_s30  ;;  %p136_p9 = scmp.lt.u32.totalorder %s132_s30, %s294_s0 }
  0x17   :  { %p138_p10 = pnand %p136_p9, %p133_p8 }
  0x19   :  { %141 = shalt.err (!%p138_p10)
}
  0x1a   :  { %s142_s8 = scalar_lea.vmem %s230_s15, 256  ;;  %p147_p12 = scmp.lt.s32.totalorder %s230_s15, %s230_s15 }
  0x1b   :  { %p143_p11 = scmp.ne.s32.totalorder %s230_s15, %s142_s8  ;;  %p148_p13 = scmp.lt.s32.totalorder %s142_s8, %s142_s8 }
  0x1d   :  { %p149_p0 = por %p148_p13, %p147_p12 }
  0x1f   :  { %p150_p1 = pnand %p149_p0, %p143_p11 }
  0x21   :  { %153 = shalt.err (!%p150_p1)
}
  0x22   :  { %22 = dma.hbm_to_vmem [thread:$0]  %s294_s0, 256, %s230_s15, [#allocation3], %s206_s24, %s206_s24, %s207_s25  }
  0x23   :  { %s208_s10 = smov [#allocation7]   ;;  %s154_s14 = scalar_lea.hbm %s296_s2, 256 }
  0x24   :  { %s40_s11 = sshll.u32 %s208_s10, 4  ;;  %p155_p2 = scmp.ne.s32.totalorder %s296_s2, %s154_s14  ;;  %s41_s11 = int_to_ptr.vmem [resolvable:$true] %s40_s11 }
  0x25   :  { %p158_p3 = scmp.lt.u32.totalorder %s154_s14, %s296_s2 }
  0x27   :  { %p160_p4 = pnand %p158_p3, %p155_p2 }
  0x29   :  { %163 = shalt.err (!%p160_p4)
}
  0x2a   :  { %s164_s20 = scalar_lea.vmem %s41_s11, 256  ;;  %p169_p6 = scmp.lt.s32.totalorder %s41_s11, %s41_s11 }
  0x2b   :  { %p165_p5 = scmp.ne.s32.totalorder %s41_s11, %s164_s20  ;;  %p170_p7 = scmp.lt.s32.totalorder %s164_s20, %s164_s20 }
  0x2d   :  { %p171_p8 = por %p170_p7, %p169_p6 }
  0x2f   :  { %p172_p9 = pnand %p171_p8, %p165_p5 }
  0x31   :  { %175 = shalt.err (!%p172_p9)
}
  0x32   :  { %46 = dma.hbm_to_vmem [thread:$0]  %s296_s2, 256, %s41_s11, [#allocation6], %s206_s24, %s206_s24, %s207_s25  }
  0x33   :  { %198 = dma.done.wait [#allocation3], 256  }
  0x34   :  { %199 = vsyncadd [#allocation3], 4294967040 }
  0x35   :  { %200 = dma.done.wait [#allocation6], 512  }
  0x36   :  { %201 = vsyncadd [#allocation6], 4294966784  ;;  %v59_v0 = vld [vmem:[#allocation5] sm:$0xff]  ;;  %v61_v1 = vld [vmem:[#allocation5 + $0x8] sm:$0xff]  ;;  %vm74_vm0 = vcmask 261120   ;;  %v79_v16 = vlaneseq  ;;  %s209_s2 = smov [#allocation8]  }
  0x37   :  { %v62_v2 = vld [vmem:[#allocation7] sm:$0xff]  ;;  %v64_v3 = vld [vmem:[#allocation7 + $0x8] sm:$0xff]  ;;  %s94_s21 = sshll.u32 %s209_s2, 4  ;;  %vm86_vm1 = vcmask 57344   ;;  %s95_s21 = int_to_ptr.vmem [resolvable:$true] %s94_s21 }
  0x38   :  { %v65_v4 = vmul.f32 %v62_v2, %v59_v0  ;;  %v66_v5 = vmul.f32 %v64_v3, %v61_v1  ;;  %v69_v6 = vmul.f32 %v64_v3, %v59_v0  ;;  %v70_v7 = vmul.f32 %v62_v2, %v61_v1  ;;  %v56_v8 = vld [vmem:[#allocation2] sm:$0xff]  ;;  %v58_v9 = vld [vmem:[#allocation2 + $0x8] sm:$0xff]  ;;  %s176_s22 = scalar_lea.vmem %s95_s21, 16  ;;  %s180_s23 = scalar_lea.vmem %s95_s21, 32 }
  0x39   :  { %v80_v17 = vand.u32 127, %v79_v16  ;;  %v82_v18 = vshrl.u32 %v79_v16, 7  ;;  %p177_p10 = scmp.ne.s32.totalorder %s95_s21, %s176_s22  ;;  %p181_p11 = scmp.lt.s32.totalorder %s95_s21, %s95_s21 }
  0x3a   :  { %v67_v10 = vadd.f32 %v66_v5, %v65_v4  ;;  %v71_v11 = vsub.f32 %v69_v6, %v70_v7  ;;  %p182_p12 = scmp.lt.s32.totalorder %s180_s23, %s176_s22 }
  0x3b   :  { %v83_v19 = vsub.s32 %v80_v17, %v82_v18 }
  0x3c   :  { %v68_v12 = vmul.f32 %v67_v10, %v56_v8  ;;  %v72_v13 = vmul.f32 %v71_v11, %v58_v9  ;;  %p183_p13 = por %p182_p12, %p181_p11 }
  0x3e   :  { %v73_v14 = vadd.f32 %v72_v13, %v68_v12  ;;  %p184_p0 = pnand %p183_p13, %p177_p10 }
  0x40   :  { %v75_v15 = vsel %vm74_vm0, %v73_v14, 0.0 }
  0x41   :  { %76 = vadd.xlane.f32.xlu0 %v75_v15 }
  0xce   :  { %v77_v20 = vpop.xlane.xlu0 %76 }
  0xcf   :  { %v84_v21 = vrot.slane %v77_v20, %v83_v19 }
  0xd1   :  { %87 = vst.msk [vmem:[#allocation8] sm:$0x1] %vm86_vm1, %v84_v21 }
  0xd2   :  { %187 = shalt.err (!%p184_p0)
}
  0xd3   :  { %s188_s26 = scalar_lea.hbm %s297_s3, 16 }
  0xd4   :  { %p189_p1 = scmp.ne.s32.totalorder %s297_s3, %s188_s26  ;;  %p192_p2 = scmp.lt.u32.totalorder %s188_s26, %s297_s3 }
  0xd6   :  { %p194_p3 = pnand %p192_p2, %p189_p1 }
  0xd8   :  { %197 = shalt.err (!%p194_p3)
}
  0xd9   :  { %97 = dma.vmem_to_hbm [thread:$0]  %s95_s21, 16, %s297_s3, [#allocation4]  }
  0xda   :  { %202 = dma.done.wait [#allocation4], 16  }
  0xdb   :  { %203 = vsyncadd [#allocation4], 4294967280 }
  0xdc   :  { %101 = vsyncpa [#allocation3], 1 }
  0xdd   :  { %102 = vsyncpa [#allocation6], 1 }
  0xde   :  { %103 = vsyncpa [#allocation4], 1 }

</bundles_post_ra>
